<compile_context>
chip_gen: v5e
topology: v5e:2x2
jax: 0.10.0
libtpu: 0.0.40
codegen_flags: <defaults>
</compile_context>

<pallas_src>
import jax
import jax.numpy as jnp
import numpy as np
from jax.experimental import pallas as pl
from jax.experimental.pallas import tpu as pltpu

NUM_REL = 7
NUM_HEADS = 3


# ----------------------------------------------------------------------------
# One-time weight preprocessing (NOT on the per-call forward path).
# ----------------------------------------------------------------------------
def prepare_weight_slab(weights):
    """weights: [NUM_REL, NUM_HEADS, d, d] nn.Linear weights (layer computes x @ W.T).

    Returns (slab, sel):
      slab [d, NUM_REL*d] : block i = mean_h W[i,h].T   for i != 3
                            block 3 = mean_h W[3,h]     (input swap of unit 3 folded in:
                                                          (b @ Wt).a == (a @ Wt.T).b)
      sel  [NUM_REL*d, NUM_REL] : block-ones selector so that
                            logits = ((a @ slab) * tile(b, NUM_REL)) @ sel
    """
    w = weights.astype(jnp.float32)
    d = w.shape[-1]
    w_mean = jnp.mean(w, axis=1)  # [NUM_REL, d, d]
    blocks = []
    for i in range(NUM_REL):
        blocks.append(w_mean[i] if i == 3 else w_mean[i].T)
    slab = jnp.concatenate(blocks, axis=1)  # [d, NUM_REL*d]

    rows = np.arange(NUM_REL * d) // d
    sel = (rows[:, None] == np.arange(NUM_REL)[None, :]).astype(np.float32)
    return slab, jnp.asarray(sel)


# ----------------------------------------------------------------------------
# Pallas kernel
# ----------------------------------------------------------------------------
def relnet_kernel(a_ref, b_ref, slab_ref, sel_ref, mask_ref, logits_ref, probs_ref):
    """Fused 7-unit relation scoring + masked softmax for one batch tile."""
    a = a_ref[...]                    # [TB, d]
    b = b_ref[...]                    # [TB, d]

    # One wide MXU matmul covering all 7 relation units (heads pre-averaged into slab).
    t = jnp.dot(a, slab_ref[...], preferred_element_type=jnp.float32)   # [TB, 7d]

    # Per-unit inner products against b: elementwise multiply by b replicated across
    # the 7 d-wide segments, then a block-ones selector matmul reduces each segment.
    b_rep = jnp.tile(b, (1, NUM_REL))                                    # [TB, 7d]
    logits = jnp.dot(t * b_rep, sel_ref[...],
                     preferred_element_type=jnp.float32)                 # [TB, 7]
    logits_ref[...] = logits

    # Masked softmax over the 7 relation classes.
    masked = logits - 1.0e6 * mask_ref[...]
    m = jnp.max(masked, axis=-1, keepdims=True)
    e = jnp.exp(masked - m)
    probs_ref[...] = e / jnp.sum(e, axis=-1, keepdims=True)


# ----------------------------------------------------------------------------
# Forward wrapper
# ----------------------------------------------------------------------------
def relnet_forward(embed_as, embed_bs, hypothesis_aligned, slab, sel, *, tb=128):
    """Forward pass.  `slab`/`sel` come from prepare_weight_slab (computed once).

    Returns (logits, probs), each [B, NUM_REL] float32.
    """
    B, d = embed_as.shape
    a = embed_as.astype(jnp.float32)
    b = embed_bs.astype(jnp.float32)

    ha = hypothesis_aligned.astype(jnp.float32)
    ones = jnp.ones((B, 1), jnp.float32)
    # cat([ha, 1-ha, ha.repeat(1,2), ones, ha, ones], dim=-1) -> [B, 7]
    rel_mask = jnp.concatenate([ha, 1.0 - ha, ha, ha, ones, ha, ones], axis=-1)

    if B <= tb:
        # Small batch: single invocation, whole problem resident in VMEM,
        # no grid / no double-buffered pipeline machinery.
        vmem = pl.BlockSpec(memory_space=pltpu.MemorySpace.VMEM)
        logits, probs = pl.pallas_call(
            relnet_kernel,
            out_shape=(
                jax.ShapeDtypeStruct((B, NUM_REL), jnp.float32),
                jax.ShapeDtypeStruct((B, NUM_REL), jnp.float32),
            ),
            in_specs=[vmem, vmem, vmem, vmem, vmem],
            out_specs=(vmem, vmem),
        )(a, b, slab, sel, rel_mask)
        return logits, probs

    # Large batch: tile the batch across a parallel grid axis (uses v7x's 2nd TC);
    # the weight slab / selector stay resident (index_map always returns block (0, 0)).
    nb = pl.cdiv(B, tb)
    Bp = nb * tb
    if Bp != B:
        pad = Bp - B
        a = jnp.pad(a, ((0, pad), (0, 0)))
        b = jnp.pad(b, ((0, pad), (0, 0)))
        rel_mask = jnp.pad(rel_mask, ((0, pad), (0, 0)))

    logits, probs = pl.pallas_call(
        relnet_kernel,
        out_shape=(
            jax.ShapeDtypeStruct((Bp, NUM_REL), jnp.float32),
            jax.ShapeDtypeStruct((Bp, NUM_REL), jnp.float32),
        ),
        grid=(nb,),
        in_specs=[
            pl.BlockSpec((tb, d), lambda i: (i, 0)),
            pl.BlockSpec((tb, d), lambda i: (i, 0)),
            pl.BlockSpec((d, NUM_REL * d), lambda i: (0, 0)),
            pl.BlockSpec((NUM_REL * d, NUM_REL), lambda i: (0, 0)),
            pl.BlockSpec((tb, NUM_REL), lambda i: (i, 0)),
        ],
        out_specs=(
            pl.BlockSpec((tb, NUM_REL), lambda i: (i, 0)),
            pl.BlockSpec((tb, NUM_REL), lambda i: (i, 0)),
        ),
        compiler_params=pltpu.CompilerParams(dimension_semantics=("parallel",)),
    )(a, b, slab, sel, rel_mask)

    if Bp != B:
        logits, probs = logits[:B], probs[:B]
    return logits, probs


# ----------------------------------------------------------------------------
# Pure-JAX reference mirroring the PyTorch forward (eval mode, dropout=0).
# ----------------------------------------------------------------------------
def relnet_reference(embed_as, embed_bs, hypothesis_aligned, weights):
    B, d = embed_as.shape
    cols = []
    for i in range(NUM_REL):
        left, right = (embed_bs, embed_as) if i == 3 else (embed_as, embed_bs)
        acc = jnp.zeros((B,), jnp.float32)
        for h in range(NUM_HEADS):
            acc = acc + jnp.sum((left @ weights[i, h].T) * right, axis=-1)
        cols.append(acc / NUM_HEADS)
    logits = jnp.stack(cols, axis=-1)
    ha = hypothesis_aligned.astype(jnp.float32)
    ones = jnp.ones((B, 1), jnp.float32)
    rel_mask = jnp.concatenate([ha, 1.0 - ha, ha, ha, ones, ha, ones], axis=-1)
    probs = jax.nn.softmax(logits - 1.0e6 * rel_mask, axis=-1)
    return logits, probs


def make_params(key, d):
    """Synthetic nn.Linear-style uniform weights; units 2 and 3 share one RelUnit."""
    bound = 1.0 / np.sqrt(d)
    keys = jax.random.split(key, NUM_REL)
    w_list = []
    for i in range(NUM_REL):
        if i == 3:
            w_list.append(w_list[2])  # shared entf_entr RelUnit
        else:
            w_list.append(
                jax.random.uniform(
                    keys[i], (NUM_HEADS, d, d), jnp.float32, minval=-bound, maxval=bound
                )
            )
    return jnp.stack(w_list, axis=0)  # [NUM_REL, NUM_HEADS, d, d]


if __name__ == "__main__":
    d = 32
    key = jax.random.PRNGKey(0)
    k_a, k_b, k_h, k_w = jax.random.split(key, 4)
    weights = make_params(k_w, d)
    slab, sel = prepare_weight_slab(weights)  # one-time weight layout work

    # --- small batch: no-grid path ---
    B = 8
    embed_as = jax.random.normal(k_a, (B, d), jnp.float32)
    embed_bs = jax.random.normal(k_b, (B, d), jnp.float32)
    hyp = jax.random.bernoulli(k_h, 0.5, (B, 1)).astype(jnp.float32)

    logits, probs = relnet_forward(embed_as, embed_bs, hyp, slab, sel)
    jax.block_until_ready((logits, probs))
    ref_logits, ref_probs = relnet_reference(embed_as, embed_bs, hyp, weights)
    np.testing.assert_allclose(np.asarray(logits), np.asarray(ref_logits), rtol=1e-4, atol=1e-4)
    np.testing.assert_allclose(np.asarray(probs), np.asarray(ref_probs), rtol=1e-4, atol=1e-4)

    # --- larger batch: batch-parallel grid path ---
    B2 = 256
    embed_as2 = jax.random.normal(k_a, (B2, d), jnp.float32)
    embed_bs2 = jax.random.normal(k_b, (B2, d), jnp.float32)
    hyp2 = jax.random.bernoulli(k_h, 0.5, (B2, 1)).astype(jnp.float32)

    logits2, probs2 = relnet_forward(embed_as2, embed_bs2, hyp2, slab, sel, tb=128)
    jax.block_until_ready((logits2, probs2))
    ref_logits2, ref_probs2 = relnet_reference(embed_as2, embed_bs2, hyp2, weights)
    np.testing.assert_allclose(np.asarray(logits2), np.asarray(ref_logits2), rtol=1e-4, atol=1e-4)
    np.testing.assert_allclose(np.asarray(probs2), np.asarray(ref_probs2), rtol=1e-4, atol=1e-4)

    print("KERNEL_OK")
</pallas_src>

<mosaic_0001>
module attributes {stable_mosaic.version = 11 : i64} {
  func.func @relnet_kernel(%arg0: memref<8x32xf32, #tpu.memory_space<vmem>>, %arg1: memref<8x32xf32, #tpu.memory_space<vmem>>, %arg2: memref<32x224xf32, #tpu.memory_space<vmem>>, %arg3: memref<224x7xf32, #tpu.memory_space<vmem>>, %arg4: memref<8x7xf32, #tpu.memory_space<vmem>>, %arg5: memref<8x7xf32, #tpu.memory_space<vmem>>, %arg6: memref<8x7xf32, #tpu.memory_space<vmem>>) attributes {dimension_semantics = [], scalar_prefetch = 0 : i64, scratch_operands = 0 : i64, tpu.core_type = #tpu.core_type<tc>} {
    %c0 = arith.constant 0 : index
    %c0_0 = arith.constant 0 : index
    %0 = vector.load %arg0[%c0, %c0_0] : memref<8x32xf32, #tpu.memory_space<vmem>>, vector<8x32xf32>
    %c0_1 = arith.constant 0 : index
    %c0_2 = arith.constant 0 : index
    %1 = vector.load %arg1[%c0_1, %c0_2] : memref<8x32xf32, #tpu.memory_space<vmem>>, vector<8x32xf32>
    %c0_3 = arith.constant 0 : index
    %c0_4 = arith.constant 0 : index
    %2 = vector.load %arg2[%c0_3, %c0_4] : memref<32x224xf32, #tpu.memory_space<vmem>>, vector<32x224xf32>
    %cst = arith.constant dense<0.000000e+00> : vector<8x224xf32>
    %3 = tpu.matmul %0, %2, %cst {dimension_numbers = #tpu.dot_dimension_numbers<[1], [0], [0], [1], [0, 0, 1, 1], [], []>} : vector<8x32xf32>, vector<32x224xf32>, vector<8x224xf32> -> vector<8x224xf32>
    %4 = tpu.concatenate %1, %1, %1, %1, %1, %1, %1 in 1 : vector<8x32xf32>, vector<8x32xf32>, vector<8x32xf32>, vector<8x32xf32>, vector<8x32xf32>, vector<8x32xf32>, vector<8x32xf32> -> vector<8x224xf32>
    %5 = arith.mulf %3, %4 : vector<8x224xf32>
    %c0_5 = arith.constant 0 : index
    %c0_6 = arith.constant 0 : index
    %6 = vector.load %arg3[%c0_5, %c0_6] : memref<224x7xf32, #tpu.memory_space<vmem>>, vector<224x7xf32>
    %cst_7 = arith.constant dense<0.000000e+00> : vector<8x7xf32>
    %7 = tpu.matmul %5, %6, %cst_7 {dimension_numbers = #tpu.dot_dimension_numbers<[1], [0], [0], [1], [0, 0, 1, 1], [], []>} : vector<8x224xf32>, vector<224x7xf32>, vector<8x7xf32> -> vector<8x7xf32>
    %c0_8 = arith.constant 0 : index
    %c0_9 = arith.constant 0 : index
    %8 = vector.load %arg5[%c0_8, %c0_9] : memref<8x7xf32, #tpu.memory_space<vmem>>, vector<8x7xf32>
    tpu.vector_store %arg5[%c0_8, %c0_9], %7 {strides = array<i32>} : memref<8x7xf32, #tpu.memory_space<vmem>>, vector<8x7xf32>,
    %c0_10 = arith.constant 0 : index
    %c0_11 = arith.constant 0 : index
    %9 = vector.load %arg4[%c0_10, %c0_11] : memref<8x7xf32, #tpu.memory_space<vmem>>, vector<8x7xf32>
    %cst_12 = arith.constant 1.000000e+06 : f32
    %10 = vector.broadcast %cst_12 : f32 to vector<8x7xf32>
    %11 = arith.mulf %10, %9 : vector<8x7xf32>
    %12 = arith.subf %7, %11 : vector<8x7xf32>
    %cst_13 = arith.constant dense<0xFF800000> : vector<8xf32>
    %13 = vector.multi_reduction <maximumf>, %12, %cst_13 [1] : vector<8x7xf32> to vector<8xf32>
    %14 = vector.shape_cast %13 : vector<8xf32> to vector<8x1xf32>
    %15 = vector.broadcast %14 : vector<8x1xf32> to vector<8x7xf32>
    %16 = arith.subf %12, %15 : vector<8x7xf32>
    %17 = math.exp %16 : vector<8x7xf32>
    %cst_14 = arith.constant dense<0.000000e+00> : vector<8xf32>
    %18 = vector.multi_reduction <add>, %17, %cst_14 [1] : vector<8x7xf32> to vector<8xf32>
    %19 = vector.shape_cast %18 : vector<8xf32> to vector<8x1xf32>
    %20 = vector.broadcast %19 : vector<8x1xf32> to vector<8x7xf32>
    %21 = arith.divf %17, %20 : vector<8x7xf32>
    %c0_15 = arith.constant 0 : index
    %c0_16 = arith.constant 0 : index
    %22 = vector.load %arg6[%c0_15, %c0_16] : memref<8x7xf32, #tpu.memory_space<vmem>>, vector<8x7xf32>
    tpu.vector_store %arg6[%c0_15, %c0_16], %21 {strides = array<i32>} : memref<8x7xf32, #tpu.memory_space<vmem>>, vector<8x7xf32>,
    return
  }
}

</mosaic_0001>

<bundles_post_ra>
// kernel: tpu_custom_call.1
= control target key start
LH: loop header
LB: loop body
LE: loop exit
PB: predicated region body
PF: predicated region fallthrough
CT: control target
= control target key end

     0   :  { %12 = vsyncpa [#allocation3], 0  ;;  %s292_s7 = smov 32   ;;  %s293_s19 = smov 96   ;;  %vm34_vm0 = vcmask 261120   ;;  %s468_s0 = inlined_call_operand.vmem [shape: f32[8,32], index: 0, kind: input, shape index: {}]   ;;  %s469_s1 = inlined_call_operand.vmem [shape: f32[8,32], index: 1, kind: input, shape index: {}]   ;;  %s470_s2 = inlined_call_operand.vmem [shape: f32[32,224], index: 2, kind: input, shape index: {}]   ;;  %s471_s3 = inlined_call_operand.vmem [shape: f32[224,7], index: 3, kind: input, shape index: {}]   ;;  %s472_s4 = inlined_call_operand.vmem [shape: f32[8,7], index: 4, kind: input, shape index: {}]   ;;  %s473_s5 = inlined_call_operand.hbm [shape: f32[8,7], index: 5, kind: output, shape index: {0}]   ;;  %s474_s6 = inlined_call_operand.hbm [shape: f32[8,7], index: 6, kind: output, shape index: {1}]  }
   0x1   :  { %v32_v0 = vld [vmem:[%s470_s2 + $0x30] sm:$0xff]  ;;  %v33_v1 = vld [vmem:[%s470_s2 + $0x38] sm:$0xff]  ;;  %v341_v2 = vld [vmem:[%s469_s1] sm:$0xff] }
   0x2   :  { %50 = vmatpush.msra.mxu0 %v32_v0  ;;  %70 = vmatpush.msra.mxu1 %v33_v1  ;;  %v30_v3 = vld [vmem:[%s470_s2 + $0x20] sm:$0xff]  ;;  %v31_v4 = vld [vmem:[%s470_s2 + $0x28] sm:$0xff]  ;;  %v28_v5 = vld [vmem:[%s470_s2 + $0x10] sm:$0xff] }
   0x3   :  { %79 = vrot.lane.b32.xlu0 %v341_v2, %s292_s7  ;;  %v29_v6 = vld [vmem:[%s470_s2 + $0x18] sm:$0xff]  ;;  %v109_v8 = vld [vmem:[%s471_s3 + $0x70] sm:$0xff]  ;;  %v26_v9 = vld [vmem:[%s470_s2] sm:$0xff] }
   0x4   :  { %51 = vmatpush.msra.mxu0 %v30_v3  ;;  %71 = vmatpush.msra.mxu1 %v31_v4  ;;  %v110_v7 = vld [vmem:[%s471_s3 + $0x78] sm:$0xff]  ;;  %v27_v10 = vld [vmem:[%s470_s2 + $0x8] sm:$0xff]  ;;  %v24_v11 = vld [vmem:[%s468_s0] sm:$0xff] }
   0x5   :  { %85 = vrot.lane.b32.xlu1 %v341_v2, %s293_s19  ;;  %126 = vmatpush.msra.mxu2 %v110_v7  ;;  %v122_v12 = vld [vmem:[%s471_s3 + $0xd8] sm:$0xff]  ;;  %v108_v13 = vld [vmem:[%s471_s3 + $0x68] sm:$0xff]  ;;  %v121_v14 = vld [vmem:[%s471_s3 + $0xd0] sm:$0xff] }
   0x6   :  { %52 = vmatpush.msra.mxu0 %v28_v5  ;;  %72 = vmatpush.msra.mxu1 %v29_v6 }
   0x7   :  { %127 = vmatpush.msra.mxu2 %v109_v8  ;;  %150 = vmatpush.msra.mxu3 %v122_v12 }
   0x8   :  { %13 = vsyncpa [#allocation5], 0  ;;  %53 = vmatpush.msra.mxu0 %v26_v9  ;;  %73 = vmatpush.msra.mxu1 %v27_v10  ;;  %v107_v15 = vld [vmem:[%s471_s3 + $0x60] sm:$0xff]  ;;  %s294_s28 = smov 64   ;;  %v106_v16 = vld [vmem:[%s471_s3 + $0x58] sm:$0xff]  ;;  %vm89_vm1 = vcmask 523264  }
   0x9   :  { %228 = vmatmul.msk.f32.vlgmr.msra.gmra.mxu0 %vm34_vm0, %v24_v11  ;;  %229 = vmatmul.msk.f32.vlgmr.msra.gmra.mxu1 %vm34_vm0, %v24_v11  ;;  %v105_v17 = vld [vmem:[%s471_s3 + $0x50] sm:$0xff]  ;;  %v104_v18 = vld [vmem:[%s471_s3 + $0x48] sm:$0xff]  ;;  %v103_v20 = vld [vmem:[%s471_s3 + $0x40] sm:$0xff]  ;;  %vm91_vm2 = vcmask 785408   ;;  %vm166_vm3 = vcmask 56320   ;;  %s203_s23 = sshll.u32 %s473_s5, 4  ;;  %s204_s23 = int_to_ptr.hbm [resolvable:$true] %s203_s23 }
   0xa   :  { %128 = vmatpush.msra.mxu2 %v108_v13  ;;  %151 = vmatpush.msra.mxu3 %v121_v14  ;;  %v120_v19 = vld [vmem:[%s471_s3 + $0xc8] sm:$0xff]  ;;  %v119_v21 = vld [vmem:[%s471_s3 + $0xc0] sm:$0xff]  ;;  %v102_v22 = vld [vmem:[%s471_s3 + $0x38] sm:$0xff]  ;;  %s295_s24 = smov [#allocation2]   ;;  %s296_s2 = smov [#allocation4]  }
   0xb   :  { %82 = vrot.lane.b32.xlu0 %v341_v2, %s294_s28  ;;  %v118_v23 = vld [vmem:[%s471_s3 + $0xb8] sm:$0xff]  ;;  %v101_v24 = vld [vmem:[%s471_s3 + $0x30] sm:$0xff]  ;;  %v100_v26 = vld [vmem:[%s471_s3 + $0x28] sm:$0xff]  ;;  %s201_s25 = sshll.u32 %s295_s24, 4  ;;  %s212_s5 = sshll.u32 %s296_s2, 4  ;;  %s202_s25 = int_to_ptr.vmem [resolvable:$true] %s201_s25  ;;  %s213_s5 = int_to_ptr.vmem [resolvable:$true] %s212_s5 }
   0xc   :  { %129 = vmatpush.msra.mxu2 %v107_v15  ;;  %152 = vmatpush.msra.mxu3 %v120_v19  ;;  %v117_v25 = vld [vmem:[%s471_s3 + $0xb0] sm:$0xff]  ;;  %v116_v27 = vld [vmem:[%s471_s3 + $0xa8] sm:$0xff]  ;;  %v99_v28 = vld [vmem:[%s471_s3 + $0x20] sm:$0xff]  ;;  %s214_s27 = sshll.u32 %s474_s6, 4  ;;  %s215_s27 = int_to_ptr.hbm [resolvable:$true] %s214_s27 }
   0xd   :  { %v115_v29 = vld [vmem:[%s471_s3 + $0xa0] sm:$0xff]  ;;  %v98_v30 = vld [vmem:[%s471_s3 + $0x18] sm:$0xff]  ;;  %v97_v32 = vld [vmem:[%s471_s3 + $0x10] sm:$0xff] }
   0xe   :  { %130 = vmatpush.msra.mxu2 %v106_v16  ;;  %153 = vmatpush.msra.mxu3 %v119_v21  ;;  %v114_v31 = vld [vmem:[%s471_s3 + $0x98] sm:$0xff]  ;;  %v113_v33 = vld [vmem:[%s471_s3 + $0x90] sm:$0xff]  ;;  %v96_v34 = vld [vmem:[%s471_s3 + $0x8] sm:$0xff] }
   0xf   :  { %v112_v35 = vld [vmem:[%s471_s3 + $0x88] sm:$0xff]  ;;  %v95_v36 = vld [vmem:[%s471_s3] sm:$0xff] }
  0x10   :  { %131 = vmatpush.msra.mxu2 %v105_v17  ;;  %154 = vmatpush.msra.mxu3 %v118_v23  ;;  %v111_v37 = vld [vmem:[%s471_s3 + $0x80] sm:$0xff] }
  0x11   :  { %v168_v48 = vld [vmem:[%s472_s4] sm:$0xff] }
  0x12   :  { %132 = vmatpush.msra.mxu2 %v104_v18  ;;  %155 = vmatpush.msra.mxu3 %v117_v25  ;;  %v169_v49 = vmul.f32 1000000.0, %v168_v48 }
  0x14   :  { %133 = vmatpush.msra.mxu2 %v103_v20  ;;  %156 = vmatpush.msra.mxu3 %v116_v27 }
  0x16   :  { %134 = vmatpush.msra.mxu2 %v102_v22  ;;  %157 = vmatpush.msra.mxu3 %v115_v29 }
  0x18   :  { %135 = vmatpush.msra.mxu2 %v101_v24  ;;  %158 = vmatpush.msra.mxu3 %v114_v31 }
  0x1a   :  { %136 = vmatpush.msra.mxu2 %v100_v26  ;;  %159 = vmatpush.msra.mxu3 %v113_v33 }
  0x1c   :  { %137 = vmatpush.msra.mxu2 %v99_v28  ;;  %160 = vmatpush.msra.mxu3 %v112_v35 }
  0x1e   :  { %138 = vmatpush.msra.mxu2 %v98_v30  ;;  %161 = vmatpush.msra.mxu3 %v111_v37 }
  0x20   :  { %139 = vmatpush.msra.mxu2 %v97_v32 }
  0x22   :  { %140 = vmatpush.msra.mxu2 %v96_v34 }
  0x24   :  { %141 = vmatpush.msra.mxu2 %v95_v36 }
  0x75   :  { %v80_v38 = vpop.permute.xlu0 %79 }
  0x76   :  { %v88_v39 = vsel %vm34_vm0, %v341_v2, %v80_v38 }
  0x77   :  { %v86_v42 = vpop.permute.xlu1 %85 }
  0x7d   :  { %v83_v40 = vpop.permute.xlu0 %82 }
  0x7e   :  { %v90_v41 = vsel %vm89_vm1, %v88_v39, %v83_v40 }
  0x7f   :  { %v92_v44 = vsel %vm91_vm2, %v90_v41, %v86_v42 }
  0x86   :  { %v55_v43 = vpop.f32.mrf.mxu0  ;;  %v75_v45 = vpop.f32.mrf.mxu1 }
  0x87   :  { %v93_v46 = vmul.f32 %v92_v44, %v55_v43  ;;  %v94_v47 = vmul.f32 %v90_v41, %v75_v45 }
  0x89   :  { %142 = vmatmul.f32.vlgmr.msra.gmra.mxu2 %v93_v46  ;;  %230 = vmatmul.msk.f32.vlgmr.msra.gmra.mxu3 %vm91_vm2, %v94_v47 }
 0x10c   :  { %v143_v50 = vpop.f32.mrf.mxu2  ;;  %v163_v51 = vpop.f32.mrf.mxu3 }
 0x10d   :  { %v164_v52 = vadd.f32 %v163_v51, %v143_v50 }
 0x10f   :  { %v170_v53 = vsub.f32 %v164_v52, %v169_v49  ;;  %167 = vst.msk [vmem:[#allocation2] sm:$0xff] %vm166_vm3, %v164_v52 }
 0x110   :  { %206 = dma.vmem_to_hbm [thread:$0]  %s202_s25, 128, %s204_s23, [#allocation3]  }
 0x111   :  { %v171_v54 = vsel %vm166_vm3, %v170_v53, -inf }
 0x112   :  { %172 = vmax.xlane.f32.xlu1 %v171_v54 }
 0x185   :  { %v173_v55 = vpop.xlane.xlu1 %172 }
 0x186   :  { %v174_v56 = vsub.f32 %v170_v53, %v173_v55 }
 0x188   :  { %v175_v57 = vmul.f32 1.442695, %v174_v56 }
 0x18a   :  { %236 = vpow2.f32 %v175_v57 }
 0x190   :  { %v237_v58 = vpop.eup %236 }
 0x191   :  { %v177_v59 = vsel %vm166_vm3, %v237_v58, 0.0 }
 0x192   :  { %178 = vadd.xlane.f32.xlu2 %v177_v59 }
 0x205   :  { %v179_v60 = vpop.xlane.xlu2 %178 }
 0x206   :  { %238 = vrcp.f32 %v179_v60  ;;  %v191_v0 = vand.u32 2147483648, %v179_v60  ;;  %v189_v2 = vand.u32 2147483647, %v179_v60  ;;  %vm185_vm5 = vweird.f32 %v179_v60 }
 0x208   :  { %v192_v4 = vor.u32 1.1754944e-38, %v191_v0  ;;  %vm190_vm7 = vcmp.eq.f32.partialorder %v189_v2, 8.507059e+37 }
 0x20c   :  { %v239_v61 = vpop.eup %238 }
 0x20d   :  { %v181_v62 = vmul.f32 %v239_v61, %v179_v60  ;;  %vm186_vm4 = vweird.f32 %v239_v61 }
 0x20e   :  { %vm187_vm6 = vmor %vm185_vm5, %vm186_vm4 }
 0x20f   :  { %v182_v63 = vsub.f32 1.0, %v181_v62 }
 0x211   :  { %v183_v1 = vmul.f32 %v239_v61, %v182_v63 }
 0x213   :  { %v184_v3 = vadd.f32 %v239_v61, %v183_v1 }
 0x215   :  { %v188_v5 = vsel %vm187_vm6, %v239_v61, %v184_v3 }
 0x216   :  { %v193_v6 = vsel %vm190_vm7, %v192_v4, %v188_v5 }
 0x217   :  { %v194_v7 = vmul.f32 %v237_v58, %v193_v6 }
 0x219   :  { %195 = vst.msk [vmem:[#allocation4] sm:$0xff] %vm166_vm3, %v194_v7 }
 0x21a   :  { %217 = dma.vmem_to_hbm [thread:$0]  %s213_s5, 128, %s215_s27, [#allocation5]  }
 0x21b   :  { %288 = dma.done.wait [#allocation3], 128  }
 0x21c   :  { %289 = vsyncadd [#allocation3], 4294967168 }
 0x21d   :  { %290 = dma.done.wait [#allocation5], 128  }
 0x21e   :  { %291 = vsyncadd [#allocation5], 4294967168 }
 0x21f   :  { %226 = vsyncpa [#allocation3], 1 }
 0x220   :  { %227 = vsyncpa [#allocation5], 1 }

</bundles_post_ra>
